<compile_context>
chip_gen: v6e
topology: v6e:2x2x1
jax: 0.10.0
libtpu: 0.0.40
codegen_flags: <defaults>
</compile_context>

<pallas_src>
import functools

import jax
import jax.numpy as jnp
from jax.experimental import pallas as pl
from jax.experimental.pallas import tpu as pltpu


_LANE = 128
_SUBLANE_BF16 = 16
_VMEM_LIMIT = 32 * 1024 * 1024  # well above the few-MiB working set, well below v7x's 64 MiB


def _round_up(x, m):
    return (x + m - 1) // m * m


# ---------------------------------------------------------------------------
# Kernel 1: write-through transform  O = X @ W   (full K resident, no scratch)
# ---------------------------------------------------------------------------
def _transform_kernel(x_ref, w_ref, o_ref):
    o_ref[...] = jnp.dot(x_ref[...], w_ref[...],
                         preferred_element_type=jnp.float32).astype(o_ref.dtype)


def transform(x, w, *, out_dtype, tm):
    n_pad, k = x.shape
    k2, h = w.shape
    assert k == k2 and n_pad % tm == 0
    return pl.pallas_call(
        _transform_kernel,
        out_shape=jax.ShapeDtypeStruct((n_pad, h), out_dtype),
        grid_spec=pltpu.PrefetchScalarGridSpec(
            num_scalar_prefetch=0,
            grid=(n_pad // tm,),
            in_specs=[
                pl.BlockSpec((tm, k), lambda i: (i, 0)),   # streamed X row block
                pl.BlockSpec((k, h), lambda i: (0, 0)),    # W resident in VMEM
            ],
            out_specs=pl.BlockSpec((tm, h), lambda i: (i, 0)),
        ),
        compiler_params=pltpu.CompilerParams(
            dimension_semantics=("parallel",),
            vmem_limit_bytes=_VMEM_LIMIT,
        ),
    )(x, w)


# ---------------------------------------------------------------------------
# Kernels 2/3: aggregation  O = maybe_relu(A_norm @ M + bias) [@ W_epilogue]
#   Single grid axis over output row tiles; A is streamed as full-width row
#   blocks, M / bias / epilogue weight stay VMEM-resident.
# ---------------------------------------------------------------------------
def _aggregate_kernel(a_ref, m_ref, b_ref, o_ref, *, apply_relu):
    acc = jnp.dot(a_ref[...], m_ref[...], preferred_element_type=jnp.float32)
    acc = acc + b_ref[...]
    if apply_relu:
        acc = jnp.maximum(acc, 0.0)
    o_ref[...] = acc.astype(o_ref.dtype)


def _aggregate_fused_kernel(a_ref, m_ref, b_ref, w_ref, o_ref, *, apply_relu):
    acc = jnp.dot(a_ref[...], m_ref[...], preferred_element_type=jnp.float32)
    acc = acc + b_ref[...]
    if apply_relu:
        acc = jnp.maximum(acc, 0.0)
    # fused layer-2 transform: (tm, H) @ (H, C) on the MXU, result written straight out
    o_ref[...] = jnp.dot(acc.astype(w_ref.dtype), w_ref[...],
                         preferred_element_type=jnp.float32).astype(o_ref.dtype)


def aggregate(a, m, bias, w=None, *, apply_relu, out_dtype, tm):
    n_pad, n_pad2 = a.shape
    n_pad3, h = m.shape
    assert n_pad == n_pad2 == n_pad3 and n_pad % tm == 0
    out_w = h if w is None else w.shape[1]

    in_specs = [
        pl.BlockSpec((tm, n_pad), lambda i: (i, 0)),   # streamed full-width A row block
        pl.BlockSpec((n_pad, h), lambda i: (0, 0)),    # transformed features, resident
        pl.BlockSpec((1, h), lambda i: (0, 0)),        # bias row, resident
    ]
    if w is None:
        kern = functools.partial(_aggregate_kernel, apply_relu=apply_relu)
        args = (a, m, bias)
    else:
        in_specs.append(pl.BlockSpec((h, out_w), lambda i: (0, 0)))  # epilogue W2, resident
        kern = functools.partial(_aggregate_fused_kernel, apply_relu=apply_relu)
        args = (a, m, bias, w)

    return pl.pallas_call(
        kern,
        out_shape=jax.ShapeDtypeStruct((n_pad, out_w), out_dtype),
        grid_spec=pltpu.PrefetchScalarGridSpec(
            num_scalar_prefetch=0,
            grid=(n_pad // tm,),
            in_specs=in_specs,
            out_specs=pl.BlockSpec((tm, out_w), lambda i: (i, 0)),
        ),
        compiler_params=pltpu.CompilerParams(
            dimension_semantics=("parallel",),
            vmem_limit_bytes=_VMEM_LIMIT,
        ),
    )(*args)


# ---------------------------------------------------------------------------
# Padding / parameter preparation (done ONCE, outside the jitted forward)
# ---------------------------------------------------------------------------
def pad_inputs(a_norm, x, w1, b1, w2, b2, *, tm_max=256):
    n, f = x.shape
    h = w1.shape[1]
    c = w2.shape[1]

    if n <= tm_max:                       # no forced 2*tm padding: tiny graphs use one tile
        n_pad = _round_up(n, _SUBLANE_BF16)
        tm = n_pad
    else:
        n_pad = _round_up(n, tm_max)
        tm = tm_max
    f_pad = _round_up(f, _LANE)
    h_pad = _round_up(h, _LANE)
    c_pad = _round_up(c, _LANE)

    bf = jnp.bfloat16
    a_p = jnp.zeros((n_pad, n_pad), bf).at[:n, :n].set(a_norm.astype(bf))
    x_p = jnp.zeros((n_pad, f_pad), bf).at[:n, :f].set(x.astype(bf))
    w1_p = jnp.zeros((f_pad, h_pad), bf).at[:f, :h].set(w1.astype(bf))
    w2_p = jnp.zeros((h_pad, c_pad), bf).at[:h, :c].set(w2.astype(bf))
    b1_p = jnp.zeros((1, h_pad), jnp.float32).at[:, :h].set(
        b1.astype(jnp.float32).reshape(1, -1))
    b2_p = jnp.zeros((1, c_pad), jnp.float32).at[:, :c].set(
        b2.astype(jnp.float32).reshape(1, -1))
    return (a_p, x_p, w1_p, b1_p, w2_p, b2_p), tm, n, c


@functools.partial(jax.jit, static_argnames=("tm",))
def gcn_forward_padded(a_p, x_p, w1_p, b1_p, w2_p, b2_p, *, tm):
    # layer 1 transform: XW1 = X @ W1   (write-through, full K)
    xw1 = transform(x_p, w1_p, out_dtype=jnp.bfloat16, tm=tm)
    # layer 1 aggregation + ReLU, fused with the layer-2 transform:
    #   HW2 = relu(A @ XW1 + b1) @ W2
    # Dropout: identity in eval mode.
    # TODO(synk): training-mode dropout (pltpu.prng_seed + stateful_bernoulli) not emitted.
    hw2 = aggregate(a_p, xw1, b1_p, w=w2_p, apply_relu=True,
                    out_dtype=jnp.bfloat16, tm=tm)
    # layer 2 aggregation:  OUT = A @ HW2 + b2
    out = aggregate(a_p, hw2, b2_p, w=None, apply_relu=False,
                    out_dtype=jnp.float32, tm=tm)
    return out


def gcn_forward(a_norm, x, w1, b1, w2, b2, *, tm_max=256):
    padded, tm, n, c = pad_inputs(a_norm, x, w1, b1, w2, b2, tm_max=tm_max)
    out = gcn_forward_padded(*padded, tm=tm)
    return out[:n, :c]


# ---------------------------------------------------------------------------
# Dense D^{-1/2} (A + remaining self loops) D^{-1/2}, matching PyG
# gcn_norm(add_self_loops=True): duplicate edges accumulate; self loops are
# added only to nodes that do not already have one.
# ---------------------------------------------------------------------------
def build_normalized_adjacency(edge_index, num_nodes):
    src, dst = edge_index[0], edge_index[1]
    a = jnp.zeros((num_nodes, num_nodes), jnp.float32)
    a = a.at[dst, src].add(1.0)                          # message flows src -> dst; dups sum
    diag = jnp.diagonal(a)
    a = a + jnp.diag(jnp.where(diag == 0.0, 1.0, 0.0))   # add_remaining_self_loops
    deg = jnp.sum(a, axis=1)                             # in-degree (incl. self loop weight)
    dinv = jnp.where(deg > 0, 1.0 / jnp.sqrt(deg), 0.0)
    return dinv[:, None] * a * dinv[None, :]


def reference_forward_bf16(a_norm, x, w1, b1, w2, b2):
    """Plain-JAX reference with the same bf16-input / f32-accumulate precision."""
    bf = jnp.bfloat16
    a = a_norm.astype(bf)
    xw1 = jnp.dot(x.astype(bf), w1.astype(bf), preferred_element_type=jnp.float32)
    h1 = jnp.maximum(
        jnp.dot(a, xw1.astype(bf), preferred_element_type=jnp.float32)
        + b1.astype(jnp.float32), 0.0)
    hw2 = jnp.dot(h1.astype(bf), w2.astype(bf), preferred_element_type=jnp.float32)
    return jnp.dot(a, hw2.astype(bf), preferred_element_type=jnp.float32) + b2


if __name__ == "__main__":
    # Small problem sizes (module's forward mandates 1433 input features).
    NUM_NODES = 8
    NUM_FEATURES = 1433
    HIDDEN = 32
    NUM_CLASSES = 7

    key = jax.random.PRNGKey(0)
    k_x, k_e, k_w1, k_w2 = jax.random.split(key, 4)

    # Node features (N, F)
    x = jax.random.normal(k_x, (NUM_NODES, NUM_FEATURES), jnp.float32)

    # Random edge list (2, E); symmetric, Cora-style.
    e_src = jax.random.randint(k_e, (12,), 0, NUM_NODES)
    e_dst = jax.random.randint(jax.random.fold_in(k_e, 1), (12,), 0, NUM_NODES)
    edge_index = jnp.stack(
        [jnp.concatenate([e_src, e_dst]), jnp.concatenate([e_dst, e_src])], axis=0
    )

    # Deterministic parameter init (Glorot-like weights, zero bias, GCNConv shapes).
    def glorot(k, shape):
        limit = jnp.sqrt(6.0 / (shape[0] + shape[1]))
        return jax.random.uniform(k, shape, jnp.float32, -limit, limit)

    w1 = glorot(k_w1, (NUM_FEATURES, HIDDEN))
    b1 = jnp.zeros((1, HIDDEN), jnp.float32)
    w2 = glorot(k_w2, (HIDDEN, NUM_CLASSES))
    b2 = jnp.zeros((1, NUM_CLASSES), jnp.float32)

    a_norm = build_normalized_adjacency(edge_index, NUM_NODES)

    out = jax.block_until_ready(gcn_forward(a_norm, x, w1, b1, w2, b2))

    ref = reference_forward_bf16(a_norm, x, w1, b1, w2, b2)
    assert out.shape == (NUM_NODES, NUM_CLASSES)
    assert jnp.allclose(out, ref, atol=1e-2, rtol=1e-2), float(
        jnp.max(jnp.abs(out - ref)))

    print("KERNEL_OK")
</pallas_src>

<mosaic_0001>
module attributes {stable_mosaic.version = 11 : i64} {
  func.func @_aggregate_kernel(%arg0: i32, %arg1: memref<16x16xbf16, #tpu.memory_space<vmem>>, %arg2: memref<16x128xbf16, #tpu.memory_space<vmem>>, %arg3: memref<1x128xf32, #tpu.memory_space<vmem>>, %arg4: memref<16x128xf32, #tpu.memory_space<vmem>>) attributes {dimension_semantics = [#tpu.dimension_semantics<parallel>], iteration_bounds = array<i64: 1>, scalar_prefetch = 0 : i64, scratch_operands = 0 : i64, tpu.core_type = #tpu.core_type<tc>, window_params = [{transform_indices = @transform_0, window_bounds = array<i64: 16, 16>}, {pipeline_mode = #tpu.pipeline_mode<synchronous>, transform_indices = @transform_1, window_bounds = array<i64: 16, 128>}, {pipeline_mode = #tpu.pipeline_mode<synchronous>, transform_indices = @transform_2, window_bounds = array<i64: 1, 128>}, {transform_indices = @transform_3, window_bounds = array<i64: 16, 128>}]} {
    %c0 = arith.constant 0 : index
    %c0_0 = arith.constant 0 : index
    %0 = vector.load %arg1[%c0, %c0_0] : memref<16x16xbf16, #tpu.memory_space<vmem>>, vector<16x16xbf16>
    %c0_1 = arith.constant 0 : index
    %c0_2 = arith.constant 0 : index
    %1 = vector.load %arg2[%c0_1, %c0_2] : memref<16x128xbf16, #tpu.memory_space<vmem>>, vector<16x128xbf16>
    %cst = arith.constant dense<0.000000e+00> : vector<16x128xf32>
    %2 = tpu.matmul %0, %1, %cst {dimension_numbers = #tpu.dot_dimension_numbers<[1], [0], [0], [1], [0, 0, 1, 1], [], []>} : vector<16x16xbf16>, vector<16x128xbf16>, vector<16x128xf32> -> vector<16x128xf32>
    %c0_3 = arith.constant 0 : index
    %c0_4 = arith.constant 0 : index
    %3 = vector.load %arg3[%c0_3, %c0_4] : memref<1x128xf32, #tpu.memory_space<vmem>>, vector<1x128xf32>
    %4 = vector.broadcast %3 : vector<1x128xf32> to vector<16x128xf32>
    %5 = arith.addf %2, %4 : vector<16x128xf32>
    %c0_5 = arith.constant 0 : index
    %c0_6 = arith.constant 0 : index
    %6 = vector.load %arg4[%c0_5, %c0_6] : memref<16x128xf32, #tpu.memory_space<vmem>>, vector<16x128xf32>
    tpu.vector_store %arg4[%c0_5, %c0_6], %5 {strides = array<i32>} : memref<16x128xf32, #tpu.memory_space<vmem>>, vector<16x128xf32>,
    return
  }
  func.func @transform_0(%arg0: i32) -> (i32, i32) {
    %c0_i32 = arith.constant 0 : i32
    %c0_i32_0 = arith.constant 0 : i32
    return %arg0, %c0_i32 : i32, i32
  }
  func.func @transform_1(%arg0: i32) -> (i32, i32) {
    %c0_i32 = arith.constant 0 : i32
    %c0_i32_0 = arith.constant 0 : i32
    %c0_i32_1 = arith.constant 0 : i32
    return %c0_i32, %c0_i32_0 : i32, i32
  }
  func.func @transform_2(%arg0: i32) -> (i32, i32) {
    %c0_i32 = arith.constant 0 : i32
    %c0_i32_0 = arith.constant 0 : i32
    %c0_i32_1 = arith.constant 0 : i32
    return %c0_i32, %c0_i32_0 : i32, i32
  }
  func.func @transform_3(%arg0: i32) -> (i32, i32) {
    %c0_i32 = arith.constant 0 : i32
    %c0_i32_0 = arith.constant 0 : i32
    return %arg0, %c0_i32 : i32, i32
  }
}

module attributes {stable_mosaic.version = 11 : i64} {
  func.func @_transform_kernel(%arg0: i32, %arg1: memref<16x1536xbf16, #tpu.memory_space<vmem>>, %arg2: memref<1536x128xbf16, #tpu.memory_space<vmem>>, %arg3: memref<16x128xbf16, #tpu.memory_space<vmem>>) attributes {dimension_semantics = [#tpu.dimension_semantics<parallel>], iteration_bounds = array<i64: 1>, scalar_prefetch = 0 : i64, scratch_operands = 0 : i64, tpu.core_type = #tpu.core_type<tc>, window_params = [{transform_indices = @transform_0, window_bounds = array<i64: 16, 1536>}, {pipeline_mode = #tpu.pipeline_mode<synchronous>, transform_indices = @transform_1, window_bounds = array<i64: 1536, 128>}, {transform_indices = @transform_2, window_bounds = array<i64: 16, 128>}]} {
    %c0 = arith.constant 0 : index
    %c0_0 = arith.constant 0 : index
    %0 = vector.load %arg1[%c0, %c0_0] : memref<16x1536xbf16, #tpu.memory_space<vmem>>, vector<16x1536xbf16>
    %c0_1 = arith.constant 0 : index
    %c0_2 = arith.constant 0 : index
    %1 = vector.load %arg2[%c0_1, %c0_2] : memref<1536x128xbf16, #tpu.memory_space<vmem>>, vector<1536x128xbf16>
    %cst = arith.constant dense<0.000000e+00> : vector<16x128xf32>
    %2 = tpu.matmul %0, %1, %cst {dimension_numbers = #tpu.dot_dimension_numbers<[1], [0], [0], [1], [0, 0, 1, 1], [], []>} : vector<16x1536xbf16>, vector<1536x128xbf16>, vector<16x128xf32> -> vector<16x128xf32>
    %3 = arith.truncf %2 : vector<16x128xf32> to vector<16x128xbf16>
    %c0_3 = arith.constant 0 : index
    %c0_4 = arith.constant 0 : index
    %4 = vector.load %arg3[%c0_3, %c0_4] : memref<16x128xbf16, #tpu.memory_space<vmem>>, vector<16x128xbf16>
    tpu.vector_store %arg3[%c0_3, %c0_4], %3 {strides = array<i32>} : memref<16x128xbf16, #tpu.memory_space<vmem>>, vector<16x128xbf16>,
    return
  }
  func.func @transform_0(%arg0: i32) -> (i32, i32) {
    %c0_i32 = arith.constant 0 : i32
    %c0_i32_0 = arith.constant 0 : i32
    return %arg0, %c0_i32 : i32, i32
  }
  func.func @transform_1(%arg0: i32) -> (i32, i32) {
    %c0_i32 = arith.constant 0 : i32
    %c0_i32_0 = arith.constant 0 : i32
    %c0_i32_1 = arith.constant 0 : i32
    return %c0_i32, %c0_i32_0 : i32, i32
  }
  func.func @transform_2(%arg0: i32) -> (i32, i32) {
    %c0_i32 = arith.constant 0 : i32
    %c0_i32_0 = arith.constant 0 : i32
    return %arg0, %c0_i32 : i32, i32
  }
}

module attributes {stable_mosaic.version = 11 : i64} {
  func.func @_aggregate_fused_kernel(%arg0: i32, %arg1: memref<16x16xbf16, #tpu.memory_space<vmem>>, %arg2: memref<16x128xbf16, #tpu.memory_space<vmem>>, %arg3: memref<1x128xf32, #tpu.memory_space<vmem>>, %arg4: memref<128x128xbf16, #tpu.memory_space<vmem>>, %arg5: memref<16x128xbf16, #tpu.memory_space<vmem>>) attributes {dimension_semantics = [#tpu.dimension_semantics<parallel>], iteration_bounds = array<i64: 1>, scalar_prefetch = 0 : i64, scratch_operands = 0 : i64, tpu.core_type = #tpu.core_type<tc>, window_params = [{transform_indices = @transform_0, window_bounds = array<i64: 16, 16>}, {pipeline_mode = #tpu.pipeline_mode<synchronous>, transform_indices = @transform_1, window_bounds = array<i64: 16, 128>}, {pipeline_mode = #tpu.pipeline_mode<synchronous>, transform_indices = @transform_2, window_bounds = array<i64: 1, 128>}, {pipeline_mode = #tpu.pipeline_mode<synchronous>, transform_indices = @transform_3, window_bounds = array<i64: 128, 128>}, {transform_indices = @transform_4, window_bounds = array<i64: 16, 128>}]} {
    %c0 = arith.constant 0 : index
    %c0_0 = arith.constant 0 : index
    %0 = vector.load %arg1[%c0, %c0_0] : memref<16x16xbf16, #tpu.memory_space<vmem>>, vector<16x16xbf16>
    %c0_1 = arith.constant 0 : index
    %c0_2 = arith.constant 0 : index
    %1 = vector.load %arg2[%c0_1, %c0_2] : memref<16x128xbf16, #tpu.memory_space<vmem>>, vector<16x128xbf16>
    %cst = arith.constant dense<0.000000e+00> : vector<16x128xf32>
    %2 = tpu.matmul %0, %1, %cst {dimension_numbers = #tpu.dot_dimension_numbers<[1], [0], [0], [1], [0, 0, 1, 1], [], []>} : vector<16x16xbf16>, vector<16x128xbf16>, vector<16x128xf32> -> vector<16x128xf32>
    %c0_3 = arith.constant 0 : index
    %c0_4 = arith.constant 0 : index
    %3 = vector.load %arg3[%c0_3, %c0_4] : memref<1x128xf32, #tpu.memory_space<vmem>>, vector<1x128xf32>
    %4 = vector.broadcast %3 : vector<1x128xf32> to vector<16x128xf32>
    %5 = arith.addf %2, %4 : vector<16x128xf32>
    %cst_5 = arith.constant 0.000000e+00 : f32
    %6 = vector.broadcast %cst_5 : f32 to vector<16x128xf32>
    %7 = arith.maximumf %5, %6 : vector<16x128xf32>
    %8 = arith.truncf %7 : vector<16x128xf32> to vector<16x128xbf16>
    %c0_6 = arith.constant 0 : index
    %c0_7 = arith.constant 0 : index
    %9 = vector.load %arg4[%c0_6, %c0_7] : memref<128x128xbf16, #tpu.memory_space<vmem>>, vector<128x128xbf16>
    %cst_8 = arith.constant dense<0.000000e+00> : vector<16x128xf32>
    %10 = tpu.matmul %8, %9, %cst_8 {dimension_numbers = #tpu.dot_dimension_numbers<[1], [0], [0], [1], [0, 0, 1, 1], [], []>} : vector<16x128xbf16>, vector<128x128xbf16>, vector<16x128xf32> -> vector<16x128xf32>
    %11 = arith.truncf %10 : vector<16x128xf32> to vector<16x128xbf16>
    %c0_9 = arith.constant 0 : index
    %c0_10 = arith.constant 0 : index
    %12 = vector.load %arg5[%c0_9, %c0_10] : memref<16x128xbf16, #tpu.memory_space<vmem>>, vector<16x128xbf16>
    tpu.vector_store %arg5[%c0_9, %c0_10], %11 {strides = array<i32>} : memref<16x128xbf16, #tpu.memory_space<vmem>>, vector<16x128xbf16>,
    return
  }
  func.func @transform_0(%arg0: i32) -> (i32, i32) {
    %c0_i32 = arith.constant 0 : i32
    %c0_i32_0 = arith.constant 0 : i32
    return %arg0, %c0_i32 : i32, i32
  }
  func.func @transform_1(%arg0: i32) -> (i32, i32) {
    %c0_i32 = arith.constant 0 : i32
    %c0_i32_0 = arith.constant 0 : i32
    %c0_i32_1 = arith.constant 0 : i32
    return %c0_i32, %c0_i32_0 : i32, i32
  }
  func.func @transform_2(%arg0: i32) -> (i32, i32) {
    %c0_i32 = arith.constant 0 : i32
    %c0_i32_0 = arith.constant 0 : i32
    %c0_i32_1 = arith.constant 0 : i32
    return %c0_i32, %c0_i32_0 : i32, i32
  }
  func.func @transform_3(%arg0: i32) -> (i32, i32) {
    %c0_i32 = arith.constant 0 : i32
    %c0_i32_0 = arith.constant 0 : i32
    %c0_i32_1 = arith.constant 0 : i32
    return %c0_i32, %c0_i32_0 : i32, i32
  }
  func.func @transform_4(%arg0: i32) -> (i32, i32) {
    %c0_i32 = arith.constant 0 : i32
    %c0_i32_0 = arith.constant 0 : i32
    return %arg0, %c0_i32 : i32, i32
  }
}

</mosaic_0001>

<bundles_post_ra>
// kernel: gcn_forward_padded.5
= control target key start
LH: loop header
LB: loop body
LE: loop exit
PB: predicated region body
PF: predicated region fallthrough
CT: control target
= control target key end

     0   :  { %v142_v1 = vmov 0.0   ;;  %vm143_vm0 = vmmov 0   ;;  %vm38_vm1 = vcmask 130048   ;;  %s179_s0 = inlined_call_operand.vmem [shape: bf16[16,16], index: 0, kind: input, shape index: {}]   ;;  %s180_s1 = inlined_call_operand.vmem [shape: bf16[16,128], index: 1, kind: input, shape index: {}]   ;;  %s181_s2 = inlined_call_operand.vmem [shape: f32[1,128], index: 2, kind: input, shape index: {}]   ;;  %s182_s3 = inlined_call_operand.hbm [shape: f32[16,128], index: 3, kind: output, shape index: {}]  }
   0x1   :  { %v118_v0 = vld [vmem:[%s180_s1] sm:$0xff]   ;;  %107 = vmatprep.subr.bf16.mxu0 %v142_v1  ;;  %109 = vmatprep.mubr.msk.bf16.mxu0 %vm143_vm0, %v142_v1 }
   0x2   :  { %v119_v2 = vld [vmem:[%s179_s0] sm:$0xff]   ;;  %108 = vmatpush3.bf16.msra.mxu0 %v118_v0 }
   0x3   :  { %8 = vsyncpa [#allocation3], 0  ;;  %v101_v3 = vld [vmem:[%s181_s2] ss:$0 sm:$0xff]  ;;  %s144_s18 = smov [#allocation2]  }
   0x4   :  { %s90_s1 = sshll.u32 %s144_s18, 4  ;;  %s91_s1 = int_to_ptr.vmem [resolvable:$true] %s90_s1 }
   0x5   :  { %110 = vmatmul.mubr.msk.bf16.vlgmr.msra.gmra.mxu0 %vm38_vm1, %v119_v2  ;;  %s120_s0 = scalar_lea.vmem %s91_s1, 256  ;;  %p125_p1 = scmp.lt.s32.totalorder %s91_s1, %s91_s1 }
   0x6   :  { %p121_p0 = scmp.ne.s32.totalorder %s91_s1, %s120_s0  ;;  %p126_p2 = scmp.lt.s32.totalorder %s120_s0, %s120_s0 }
   0x8   :  { %p127_p3 = por %p126_p2, %p125_p1 }
   0xa   :  { %p128_p4 = pnand %p127_p3, %p121_p0 }
  0xc5   :  { %v76_v4 = vpop.f32.mrf.mxu0 }
  0xc6   :  { %v77_v5 = vadd.f32 %v101_v3, %v76_v4 }
  0xc7   :  { %v111_v6 = vpop.f32.mrf.mxu0 }
  0xc8   :  { %83 = vst [vmem:[#allocation2] sm:$0xff] %v77_v5 }
  0xc9   :  { %v79_v7 = vpop.f32.mrf.mxu0 }
  0xca   :  { %v80_v8 = vadd.f32 %v101_v3, %v79_v7 }
  0xcb   :  { %v112_v9 = vpop.f32.mrf.mxu0 }
  0xcc   :  { %84 = vst [vmem:[#allocation2 + $0x8] sm:$0xff] %v80_v8 }
  0xcd   :  { %131 = shalt.err (!%p128_p4)
}
  0xce   :  { %s145_s19 = smov 128   ;;  %s146_s2 = smov 8  }
  0xcf   :  { %96 = dma.vmem_to_hbm [thread:$0]  %s91_s1, 256, %s182_s3, [#allocation3], %s145_s19, %s145_s19, %s146_s2  }
  0xd0   :  { %140 = dma.done.wait [#allocation3], 256  }
  0xd1   :  { %141 = vsyncadd [#allocation3], 4294967040 }
  0xd2   :  { %100 = vsyncpa [#allocation3], 1 }

// kernel: gcn_forward_padded.4
= control target key start
LH: loop header
LB: loop body
LE: loop exit
PB: predicated region body
PF: predicated region fallthrough
CT: control target
= control target key end

     0   :  { %v277_v0 = vmov 0.0   ;;  %vm278_vm0 = vmmov 0   ;;  %vm40_vm1 = vcmask 130048   ;;  %s340_s1 = inlined_call_operand.vmem [shape: bf16[16,128], index: 1, kind: input, shape index: {}]   ;;  %s341_s0 = inlined_call_operand.vmem [shape: bf16[16,16], index: 0, kind: input, shape index: {}]   ;;  %s342_s3 = inlined_call_operand.vmem [shape: bf16[128,128], index: 3, kind: input, shape index: {}]   ;;  %s343_s2 = inlined_call_operand.vmem [shape: f32[1,128], index: 2, kind: input, shape index: {}]   ;;  %s344_s4 = inlined_call_operand.vmem [shape: bf16[16,128], index: 4, kind: output, shape index: {}]  }
   0x1   :  { %239 = vmatprep.subr.bf16.mxu0 %v277_v0  ;;  %v267_v1 = vld [vmem:[%s340_s1] sm:$0xff]   ;;  %241 = vmatprep.mubr.msk.bf16.mxu0 %vm278_vm0, %v277_v0  ;;  %v269_v3 = vld [vmem:[%s342_s3 + $0x38] sm:$0xff]   ;;  %v270_v4 = vld [vmem:[%s342_s3 + $0x30] sm:$0xff]  }
   0x2   :  { %v268_v2 = vld [vmem:[%s341_s0] sm:$0xff]   ;;  %245 = vmatprep.subr.bf16.mxu1 %v277_v0  ;;  %261 = vmatprep.mubr.msk.bf16.mxu1 %vm278_vm0, %v277_v0  ;;  %v271_v5 = vld [vmem:[%s342_s3 + $0x28] sm:$0xff]   ;;  %v273_v7 = vld [vmem:[%s342_s3 + $0x18] sm:$0xff]  }
   0x3   :  { %240 = vmatpush3.bf16.msra.mxu0 %v267_v1  ;;  %246 = vmatpush3.bf16.msra.mxu1 %v269_v3  ;;  %v272_v6 = vld [vmem:[%s342_s3 + $0x20] sm:$0xff]   ;;  %v274_v8 = vld [vmem:[%s342_s3 + $0x10] sm:$0xff]   ;;  %v275_v9 = vld [vmem:[%s342_s3 + $0x8] sm:$0xff]  }
   0x4   :  { %247 = vmatprep.subr.bf16.mxu1 %v277_v0  ;;  %v276_v10 = vld [vmem:[%s342_s3] sm:$0xff]  }
   0x5   :  { %v207_v11 = vld [vmem:[%s343_s2] ss:$0 sm:$0xff] }
   0x6   :  { %242 = vmatmul.mubr.msk.bf16.vlgmr.msra.gmra.mxu0 %vm40_vm1, %v268_v2 }
   0x7   :  { %248 = vmatpush3.bf16.msra.mxu1 %v270_v4 }
   0x8   :  { %249 = vmatprep.subr.bf16.mxu1 %v277_v0 }
   0xb   :  { %250 = vmatpush3.bf16.msra.mxu1 %v271_v5 }
   0xc   :  { %251 = vmatprep.subr.bf16.mxu1 %v277_v0 }
   0xf   :  { %252 = vmatpush3.bf16.msra.mxu1 %v272_v6 }
  0x10   :  { %253 = vmatprep.subr.bf16.mxu1 %v277_v0 }
  0x13   :  { %254 = vmatpush3.bf16.msra.mxu1 %v273_v7 }
  0x14   :  { %255 = vmatprep.subr.bf16.mxu1 %v277_v0 }
  0x17   :  { %256 = vmatpush3.bf16.msra.mxu1 %v274_v8 }
  0x18   :  { %257 = vmatprep.subr.bf16.mxu1 %v277_v0 }
  0x1b   :  { %258 = vmatpush3.bf16.msra.mxu1 %v275_v9 }
  0x1c   :  { %259 = vmatprep.subr.bf16.mxu1 %v277_v0 }
  0x1f   :  { %260 = vmatpush3.bf16.msra.mxu1 %v276_v10 }
  0xc6   :  { %v78_v12 = vpop.f32.mrf.mxu0 }
  0xc7   :  { %v79_v14 = vadd.f32 %v207_v11, %v78_v12 }
  0xc8   :  { %v243_v13 = vpop.f32.mrf.mxu0 }
  0xc9   :  { %v85_v18 = vmax.f32 %v79_v14, 0.0 }
  0xca   :  { %v81_v15 = vpop.f32.mrf.mxu0 }
  0xcb   :  { %v82_v16 = vadd.f32 %v207_v11, %v81_v15 }
  0xcc   :  { %v244_v17 = vpop.f32.mrf.mxu0 }
  0xcd   :  { %v86_v19 = vmax.f32 %v82_v16, 0.0 }
  0xcf   :  { %v87_v20 = vpack.c.bf16 %v86_v19, %v85_v18 }
  0xd1   :  { %262 = vmatmul.mubr.bf16.vlgmr.msra.gmra.mxu1 %v87_v20 }
 0x191   :  { %v186_v21 = vpop.f32.mrf.mxu1 }
 0x193   :  { %v263_v22 = vpop.f32.mrf.mxu1 }
 0x195   :  { %v189_v23 = vpop.f32.mrf.mxu1 }
 0x196   :  { %v226_v24 = vpack.c.bf16 %v189_v23, %v186_v21 }
 0x197   :  { %v264_v25 = vpop.f32.mrf.mxu1 }
 0x198   :  { %227 = vst [vmem:[%s344_s4] sm:$0xff] %v226_v24  }

// kernel: gcn_forward_padded.3
= control target key start
LH: loop header
LB: loop body
LE: loop exit
PB: predicated region body
PF: predicated region fallthrough
CT: control target
= control target key end

     0   :  { %7 = vsyncpa [#allocation3], 0  ;;  %s1585_s0 = inlined_call_operand.hbm [shape: bf16[16,1536], index: 0, kind: input, shape index: {}]   ;;  %s1586_s1 = inlined_call_operand.hbm [shape: bf16[1536,128], index: 1, kind: input, shape index: {}]   ;;  %s1587_s2 = inlined_call_operand.vmem [shape: bf16[16,128], index: 2, kind: output, shape index: {}]  }
   0x1   :  { %8 = vsyncpa [#allocation5], 0  ;;  %s1555_s9 = smov [#allocation2]  }
   0x2   :  { %s14_s10 = sshll.u32 %s1555_s9, 4  ;;  %s15_s10 = int_to_ptr.vmem [resolvable:$true] %s14_s10 }
   0x3   :  { %s1519_s11 = scalar_lea.vmem %s15_s10, 1536  ;;  %p1524_p1 = scmp.lt.s32.totalorder %s15_s10, %s15_s10 }
   0x4   :  { %p1520_p0 = scmp.ne.s32.totalorder %s15_s10, %s1519_s11  ;;  %p1525_p2 = scmp.lt.s32.totalorder %s1519_s11, %s1519_s11 }
   0x6   :  { %p1526_p3 = por %p1525_p2, %p1524_p1 }
   0x8   :  { %p1527_p4 = pnand %p1526_p3, %p1520_p0 }
   0xa   :  { %1530 = shalt.err (!%p1527_p4)
}
   0xb   :  { %s1556_s12 = smov 768   ;;  %s1557_s13 = smov 48  }
   0xc   :  { %20 = dma.hbm_to_vmem [thread:$0]  %s1585_s0, 1536, %s15_s10, [#allocation3], %s1556_s12, %s1556_s12, %s1557_s13  }
   0xd   :  { %s1558_s16 = smov [#allocation4]  }
   0xe   :  { %s26_s17 = sshll.u32 %s1558_s16, 4  ;;  %s27_s17 = int_to_ptr.vmem [resolvable:$true] %s26_s17 }
   0xf   :  { %s1539_s18 = scalar_lea.vmem %s27_s17, 12288  ;;  %p1544_p6 = scmp.lt.s32.totalorder %s27_s17, %s27_s17 }
  0x10   :  { %p1540_p5 = scmp.ne.s32.totalorder %s27_s17, %s1539_s18  ;;  %p1545_p7 = scmp.lt.s32.totalorder %s1539_s18, %s1539_s18 }
  0x12   :  { %p1546_p8 = por %p1545_p7, %p1544_p6 }
  0x14   :  { %p1547_p9 = pnand %p1546_p8, %p1540_p5 }
  0x16   :  { %1550 = shalt.err (!%p1547_p9)
}
  0x17   :  { %s1559_s19 = smov 64   ;;  %s1560_s20 = smov 4  }
  0x18   :  { %32 = dma.hbm_to_vmem [thread:$0]  %s1586_s1, 12288, %s27_s17, [#allocation5], %s1559_s19, %s1559_s19, %s1560_s20  }
  0x19   :  { %1551 = dma.done.wait [#allocation3], 1536  }
  0x1a   :  { %1552 = vsyncadd [#allocation3], 4294965760 }
  0x1b   :  { %1553 = dma.done.wait [#allocation5], 12288  }
  0x1c   :  { %1554 = vsyncadd [#allocation5], 4294955008  ;;  %v1397_v0 = vld [vmem:[#allocation4 + $0x78] sm:$0xff]   ;;  %v1401_v4 = vld [vmem:[#allocation4 + $0x70] sm:$0xff]  }
  0x1d   :  { %v1398_v1 = vld [vmem:[#allocation4 + $0xf8] sm:$0xff]   ;;  %1259 = vmatprep.subr.bf16.mxu0 %v1397_v0  ;;  %v1402_v5 = vld [vmem:[#allocation4 + $0xf0] sm:$0xff]   ;;  %v1405_v8 = vld [vmem:[#allocation4 + $0x68] sm:$0xff]  }
  0x1e   :  { %v1399_v2 = vld [vmem:[#allocation4 + $0x38] sm:$0xff]   ;;  %1281 = vmatprep.subr.bf16.mxu1 %v1398_v1  ;;  %v1403_v6 = vld [vmem:[#allocation4 + $0x30] sm:$0xff]   ;;  %v1406_v9 = vld [vmem:[#allocation4 + $0xe8] sm:$0xff]  }
  0x1f   :  { %v1400_v3 = vld [vmem:[#allocation4 + $0xb8] sm:$0xff]   ;;  %1260 = vmatpush3.bf16.msra.mxu0 %v1399_v2  ;;  %v1404_v7 = vld [vmem:[#allocation4 + $0xb0] sm:$0xff]   ;;  %v1407_v10 = vld [vmem:[#allocation4 + $0x28] sm:$0xff]  }
  0x20   :  { %1282 = vmatpush3.bf16.msra.mxu1 %v1400_v3  ;;  %1261 = vmatprep.subr.bf16.mxu0 %v1401_v4  ;;  %v1408_v11 = vld [vmem:[#allocation4 + $0xa8] sm:$0xff]   ;;  %v1409_v12 = vld [vmem:[#allocation4 + $0x60] sm:$0xff]   ;;  %v1413_v16 = vld [vmem:[#allocation4 + $0x58] sm:$0xff]  }
  0x21   :  { %1283 = vmatprep.subr.bf16.mxu1 %v1402_v5  ;;  %v1410_v13 = vld [vmem:[#allocation4 + $0xe0] sm:$0xff]   ;;  %v1414_v17 = vld [vmem:[#allocation4 + $0xd8] sm:$0xff]   ;;  %v1417_v20 = vld [vmem:[#allocation4 + $0x50] sm:$0xff]  }
  0x22   :  { %v1411_v14 = vld [vmem:[#allocation4 + $0x20] sm:$0xff]   ;;  %v1415_v18 = vld [vmem:[#allocation4 + $0x18] sm:$0xff]   ;;  %v1418_v21 = vld [vmem:[#allocation4 + $0xd0] sm:$0xff]  }
  0x23   :  { %1262 = vmatpush3.bf16.msra.mxu0 %v1403_v6  ;;  %v1412_v15 = vld [vmem:[#allocation4 + $0xa0] sm:$0xff]   ;;  %v1416_v19 = vld [vmem:[#allocation4 + $0x98] sm:$0xff]   ;;  %v1419_v22 = vld [vmem:[#allocation4 + $0x10] sm:$0xff]  }
  0x24   :  { %1284 = vmatpush3.bf16.msra.mxu1 %v1404_v7  ;;  %1263 = vmatprep.subr.bf16.mxu0 %v1405_v8  ;;  %v1420_v23 = vld [vmem:[#allocation4 + $0x90] sm:$0xff]   ;;  %v1421_v24 = vld [vmem:[#allocation4 + $0x48] sm:$0xff]   ;;  %v1425_v28 = vld [vmem:[#allocation4 + $0x40] sm:$0xff]  }
  0x25   :  { %1285 = vmatprep.subr.bf16.mxu1 %v1406_v9  ;;  %v1422_v25 = vld [vmem:[#allocation4 + $0xc8] sm:$0xff]   ;;  %v1426_v29 = vld [vmem:[#allocation4 + $0xc0] sm:$0xff]   ;;  %v1435_v36 = vld [vmem:[#allocation4 + $0x178] sm:$0xff]  }
  0x26   :  { %v1423_v26 = vld [vmem:[#allocation4 + $0x8] sm:$0xff]   ;;  %v1427_v30 = vld [vmem:[#allocation4] sm:$0xff]   ;;  %v1436_v37 = vld [vmem:[#allocation4 + $0x1f8] sm:$0xff]  }
  0x27   :  { %1264 = vmatpush3.bf16.msra.mxu0 %v1407_v10  ;;  %v1424_v27 = vld [vmem:[#allocation4 + $0x88] sm:$0xff]   ;;  %v1428_v31 = vld [vmem:[#allocation4 + $0x80] sm:$0xff]   ;;  %v1437_v38 = vld [vmem:[#allocation4 + $0x138] sm:$0xff]  }
  0x28   :  { %1286 = vmatpush3.bf16.msra.mxu1 %v1408_v11  ;;  %1265 = vmatprep.subr.bf16.mxu0 %v1409_v12  ;;  %v1429_v32 = vld [vmem:[#allocation2] ss:$48 sps:$4 sm:$0xff]   ;;  %v1431_v33 = vld [vmem:[#allocation2 + $0x4] ss:$48 sps:$4 sm:$0xff]   ;;  %v1432_v34 = vld [vmem:[#allocation2 + $0x8] ss:$48 sps:$4 sm:$0xff]  }
  0x29   :  { %1287 = vmatprep.subr.bf16.mxu1 %v1410_v13  ;;  %v1434_v35 = vld [vmem:[#allocation2 + $0xc] ss:$48 sps:$4 sm:$0xff]   ;;  %912 = vmatprep.mubr.bf16.mxu0 %v1431_v33  ;;  %v1439_v40 = vld [vmem:[#allocation4 + $0x170] sm:$0xff]   ;;  %v1447_v48 = vld [vmem:[#allocation4 + $0x160] sm:$0xff]  }
  0x2a   :  { %953 = vmatprep.mubr.bf16.mxu1 %v1434_v35  ;;  %v1438_v39 = vld [vmem:[#allocation4 + $0x1b8] sm:$0xff]   ;;  %v1440_v41 = vld [vmem:[#allocation4 + $0x1f0] sm:$0xff]   ;;  %v1443_v44 = vld [vmem:[#allocation4 + $0x168] sm:$0xff]  }
  0x2b   :  { %1266 = vmatpush3.bf16.msra.mxu0 %v1411_v14  ;;  %v1441_v42 = vld [vmem:[#allocation4 + $0x130] sm:$0xff]   ;;  %v1444_v45 = vld [vmem:[#allocation4 + $0x1e8] sm:$0xff]   ;;  %v1448_v49 = vld [vmem:[#allocation4 + $0x1e0] sm:$0xff]  }
  0x2c   :  { %1288 = vmatpush3.bf16.msra.mxu1 %v1412_v15  ;;  %1267 = vmatprep.subr.bf16.mxu0 %v1413_v16  ;;  %v1442_v43 = vld [vmem:[#allocation4 + $0x1b0] sm:$0xff]   ;;  %v1445_v46 = vld [vmem:[#allocation4 + $0x128] sm:$0xff]   ;;  %v1449_v50 = vld [vmem:[#allocation4 + $0x120] sm:$0xff]  }
  0x2d   :  { %1289 = vmatprep.subr.bf16.mxu1 %v1414_v17  ;;  %v1446_v47 = vld [vmem:[#allocation4 + $0x1a8] sm:$0xff]   ;;  %v1450_v51 = vld [vmem:[#allocation4 + $0x1a0] sm:$0xff]   ;;  %v1451_v52 = vld [vmem:[#allocation4 + $0x158] sm:$0xff]  }
  0x2e   :  { %v1452_v53 = vld [vmem:[#allocation4 + $0x1d8] sm:$0xff]   ;;  %v1455_v56 = vld [vmem:[#allocation4 + $0x150] sm:$0xff]   ;;  %v1459_v60 = vld [vmem:[#allocation4 + $0x148] sm:$0xff]  }
  0x2f   :  { %1268 = vmatpush3.bf16.msra.mxu0 %v1415_v18  ;;  %v1453_v54 = vld [vmem:[#allocation4 + $0x118] sm:$0xff]   ;;  %v1456_v57 = vld [vmem:[#allocation4 + $0x1d0] sm:$0xff]   ;;  %v1460_v61 = vld [vmem:[#allocation4 + $0x1c8] sm:$0xff]  }
  0x30   :  { %1290 = vmatpush3.bf16.msra.mxu1 %v1416_v19  ;;  %1269 = vmatprep.subr.bf16.mxu0 %v1417_v20  ;;  %v1454_v55 = vld [vmem:[#allocation4 + $0x198] sm:$0xff]   ;;  %v1457_v58 = vld [vmem:[#allocation4 + $0x110] sm:$0xff]   ;;  %v1461_v62 = vld [vmem:[#allocation4 + $0x108] sm:$0xff]  }
  0x31   :  { %1291 = vmatprep.subr.bf16.mxu1 %v1418_v21  ;;  %v1458_v59 = vld [vmem:[#allocation4 + $0x190] sm:$0xff]   ;;  %v1462_v63 = vld [vmem:[#allocation4 + $0x188] sm:$0xff]   ;;  %v1463_v0 = vld [vmem:[#allocation4 + $0x140] sm:$0xff]  }
  0x32   :  { %v1464_v1 = vld [vmem:[#allocation4 + $0x1c0] sm:$0xff]   ;;  %v1470_v6 = vld [vmem:[#allocation2 + $0x18] ss:$48 sps:$4 sm:$0xff]   ;;  %v1472_v7 = vld [vmem:[#allocation2 + $0x1c] ss:$48 sps:$4 sm:$0xff]  }
  0x33   :  { %1270 = vmatpush3.bf16.msra.mxu0 %v1419_v22  ;;  %v1465_v2 = vld [vmem:[#allocation4 + $0x100] sm:$0xff]   ;;  %v1473_v8 = vld [vmem:[#allocation4 + $0x278] sm:$0xff]   ;;  %v1477_v12 = vld [vmem:[#allocation4 + $0x270] sm:$0xff]  }
  0x34   :  { %1292 = vmatpush3.bf16.msra.mxu1 %v1420_v23  ;;  %1271 = vmatprep.subr.bf16.mxu0 %v1421_v24  ;;  %v1466_v3 = vld [vmem:[#allocation4 + $0x180] sm:$0xff]   ;;  %v1474_v9 = vld [vmem:[#allocation4 + $0x2f8] sm:$0xff]   ;;  %v1478_v13 = vld [vmem:[#allocation4 + $0x2f0] sm:$0xff]  }
  0x35   :  { %1293 = vmatprep.subr.bf16.mxu1 %v1422_v25  ;;  %v1467_v4 = vld [vmem:[#allocation2 + $0x10] ss:$48 sps:$4 sm:$0xff]   ;;  %v1469_v5 = vld [vmem:[#allocation2 + $0x14] ss:$48 sps:$4 sm:$0xff]   ;;  %v1475_v10 = vld [vmem:[#allocation4 + $0x238] sm:$0xff]  }
  0x36   :  { %v1476_v11 = vld [vmem:[#allocation4 + $0x2b8] sm:$0xff]   ;;  %v1479_v14 = vld [vmem:[#allocation4 + $0x230] sm:$0xff]   ;;  %v1481_v16 = vld [vmem:[#allocation4 + $0x268] sm:$0xff]  }
  0x37   :  { %1272 = vmatpush3.bf16.msra.mxu0 %v1423_v26  ;;  %v1480_v15 = vld [vmem:[#allocation4 + $0x2b0] sm:$0xff]   ;;  %v1482_v17 = vld [vmem:[#allocation4 + $0x2e8] sm:$0xff]   ;;  %v1485_v20 = vld [vmem:[#allocation4 + $0x260] sm:$0xff]  }
  0x38   :  { %1294 = vmatpush3.bf16.msra.mxu1 %v1424_v27  ;;  %1273 = vmatprep.subr.bf16.mxu0 %v1425_v28  ;;  %v1483_v18 = vld [vmem:[#allocation4 + $0x228] sm:$0xff]   ;;  %v1486_v21 = vld [vmem:[#allocation4 + $0x2e0] sm:$0xff]   ;;  %v1489_v24 = vld [vmem:[#allocation4 + $0x258] sm:$0xff]  }
  0x39   :  { %1295 = vmatprep.subr.bf16.mxu1 %v1426_v29  ;;  %v1484_v19 = vld [vmem:[#allocation4 + $0x2a8] sm:$0xff]   ;;  %v1487_v22 = vld [vmem:[#allocation4 + $0x220] sm:$0xff]   ;;  %v1490_v25 = vld [vmem:[#allocation4 + $0x2d8] sm:$0xff]  }
  0x3a   :  { %v1488_v23 = vld [vmem:[#allocation4 + $0x2a0] sm:$0xff]   ;;  %v1491_v26 = vld [vmem:[#allocation4 + $0x218] sm:$0xff]   ;;  %v1493_v28 = vld [vmem:[#allocation4 + $0x250] sm:$0xff]  }
  0x3b   :  { %1274 = vmatpush3.bf16.msra.mxu0 %v1427_v30  ;;  %v1492_v27 = vld [vmem:[#allocation4 + $0x298] sm:$0xff]   ;;  %v1494_v29 = vld [vmem:[#allocation4 + $0x2d0] sm:$0xff]   ;;  %v1498_v33 = vld [vmem:[#allocation4 + $0x2c8] sm:$0xff]  }
  0x3c   :  { %1296 = vmatpush3.bf16.msra.mxu1 %v1428_v31  ;;  %1303 = vmatprep.subr.bf16.mxu0 %v1435_v36  ;;  %v1495_v30 = vld [vmem:[#allocation4 + $0x210] sm:$0xff]   ;;  %v1500_v35 = vld [vmem:[#allocation4 + $0x288] sm:$0xff]   ;;  %v1501_v36 = vld [vmem:[#allocation4 + $0x240] sm:$0xff]  }
  0x3d   :  { %1325 = vmatprep.subr.bf16.mxu1 %v1436_v37  ;;  %v1496_v31 = vld [vmem:[#allocation4 + $0x290] sm:$0xff]   ;;  %v1502_v37 = vld [vmem:[#allocation4 + $0x2c0] sm:$0xff]  }
  0x3e   :  { %913 = vmatmul.mubr.bf16.vlgmr.msra.gmra.mxu0 %v1429_v32  ;;  %v1497_v32 = vld [vmem:[#allocation4 + $0x248] sm:$0xff]  }
  0x3f   :  { %954 = vmatmul.mubr.bf16.vlgmr.msra.gmra.mxu1 %v1432_v34  ;;  %1304 = vmatpush3.bf16.msra.mxu0 %v1437_v38  ;;  %v1499_v34 = vld [vmem:[#allocation4 + $0x208] sm:$0xff]   ;;  %v1503_v38 = vld [vmem:[#allocation4 + $0x200] sm:$0xff]  }
  0x40   :  { %1326 = vmatpush3.bf16.msra.mxu1 %v1438_v39  ;;  %1305 = vmatprep.subr.bf16.mxu0 %v1439_v40  ;;  %v1504_v39 = vld [vmem:[#allocation4 + $0x280] sm:$0xff]  }
  0x41   :  { %1327 = vmatprep.subr.bf16.mxu1 %v1440_v41  ;;  %994 = vmatprep.mubr.bf16.mxu0 %v1469_v5  ;;  %v1505_v40 = vld [vmem:[#allocation2 + $0x20] ss:$48 sps:$4 sm:$0xff]   ;;  %v1507_v41 = vld [vmem:[#allocation2 + $0x24] ss:$48 sps:$4 sm:$0xff]  }
  0x42   :  { %1035 = vmatprep.mubr.bf16.mxu1 %v1472_v7 }
  0x43   :  { %1306 = vmatpush3.bf16.msra.mxu0 %v1441_v42  ;;  %v1508_v42 = vld [vmem:[#allocation2 + $0x28] ss:$48 sps:$4 sm:$0xff]  }
  0x44   :  { %1328 = vmatpush3.bf16.msra.mxu1 %v1442_v43  ;;  %1307 = vmatprep.subr.bf16.mxu0 %v1443_v44  ;;  %v1510_v43 = vld [vmem:[#allocation2 + $0x2c] ss:$48 sps:$4 sm:$0xff]  }
  0x45   :  { %1329 = vmatprep.subr.bf16.mxu1 %v1444_v45 }
  0x47   :  { %1308 = vmatpush3.bf16.msra.mxu0 %v1445_v46 }
  0x48   :  { %1330 = vmatpush3.bf16.msra.mxu1 %v1446_v47  ;;  %1309 = vmatprep.subr.bf16.mxu0 %v1447_v48 }
  0x49   :  { %1331 = vmatprep.subr.bf16.mxu1 %v1448_v49 }
  0x4b   :  { %1310 = vmatpush3.bf16.msra.mxu0 %v1449_v50 }
  0x4c   :  { %1332 = vmatpush3.bf16.msra.mxu1 %v1450_v51  ;;  %1311 = vmatprep.subr.bf16.mxu0 %v1451_v52 }
  0x4d   :  { %1333 = vmatprep.subr.bf16.mxu1 %v1452_v53 }
  0x4f   :  { %1312 = vmatpush3.bf16.msra.mxu0 %v1453_v54 }
  0x50   :  { %1334 = vmatpush3.bf16.msra.mxu1 %v1454_v55  ;;  %1313 = vmatprep.subr.bf16.mxu0 %v1455_v56 }
  0x51   :  { %1335 = vmatprep.subr.bf16.mxu1 %v1456_v57 }
  0x53   :  { %1314 = vmatpush3.bf16.msra.mxu0 %v1457_v58 }
  0x54   :  { %1336 = vmatpush3.bf16.msra.mxu1 %v1458_v59  ;;  %1315 = vmatprep.subr.bf16.mxu0 %v1459_v60 }
  0x55   :  { %1337 = vmatprep.subr.bf16.mxu1 %v1460_v61 }
  0x57   :  { %1316 = vmatpush3.bf16.msra.mxu0 %v1461_v62 }
  0x58   :  { %1338 = vmatpush3.bf16.msra.mxu1 %v1462_v63  ;;  %1317 = vmatprep.subr.bf16.mxu0 %v1463_v0 }
  0x59   :  { %1339 = vmatprep.subr.bf16.mxu1 %v1464_v1 }
  0x5b   :  { %1318 = vmatpush3.bf16.msra.mxu0 %v1465_v2 }
  0x5c   :  { %1340 = vmatpush3.bf16.msra.mxu1 %v1466_v3  ;;  %1347 = vmatprep.subr.bf16.mxu0 %v1473_v8 }
  0x5d   :  { %1369 = vmatprep.subr.bf16.mxu1 %v1474_v9 }
  0x5e   :  { %995 = vmatmul.mubr.bf16.vlgmr.msra.gmra.mxu0 %v1467_v4 }
  0x5f   :  { %1036 = vmatmul.mubr.bf16.vlgmr.msra.gmra.mxu1 %v1470_v6  ;;  %1348 = vmatpush3.bf16.msra.mxu0 %v1475_v10 }
  0x60   :  { %1370 = vmatpush3.bf16.msra.mxu1 %v1476_v11  ;;  %1349 = vmatprep.subr.bf16.mxu0 %v1477_v12 }
  0x61   :  { %1371 = vmatprep.subr.bf16.mxu1 %v1478_v13  ;;  %1076 = vmatprep.mubr.bf16.mxu0 %v1507_v41 }
  0x62   :  { %1117 = vmatprep.mubr.bf16.mxu1 %v1510_v43 }
  0x63   :  { %1350 = vmatpush3.bf16.msra.mxu0 %v1479_v14 }
  0x64   :  { %1372 = vmatpush3.bf16.msra.mxu1 %v1480_v15  ;;  %1351 = vmatprep.subr.bf16.mxu0 %v1481_v16 }
  0x65   :  { %1373 = vmatprep.subr.bf16.mxu1 %v1482_v17 }
  0x67   :  { %1352 = vmatpush3.bf16.msra.mxu0 %v1483_v18 }
  0x68   :  { %1374 = vmatpush3.bf16.msra.mxu1 %v1484_v19  ;;  %1353 = vmatprep.subr.bf16.mxu0 %v1485_v20 }
  0x69   :  { %1375 = vmatprep.subr.bf16.mxu1 %v1486_v21 }
  0x6b   :  { %1354 = vmatpush3.bf16.msra.mxu0 %v1487_v22 }
  0x6c   :  { %1376 = vmatpush3.bf16.msra.mxu1 %v1488_v23  ;;  %1355 = vmatprep.subr.bf16.mxu0 %v1489_v24 }
  0x6d   :  { %1377 = vmatprep.subr.bf16.mxu1 %v1490_v25 }
  0x6f   :  { %1356 = vmatpush3.bf16.msra.mxu0 %v1491_v26 }
  0x70   :  { %1378 = vmatpush3.bf16.msra.mxu1 %v1492_v27  ;;  %1357 = vmatprep.subr.bf16.mxu0 %v1493_v28 }
  0x71   :  { %1379 = vmatprep.subr.bf16.mxu1 %v1494_v29 }
  0x73   :  { %1358 = vmatpush3.bf16.msra.mxu0 %v1495_v30 }
  0x74   :  { %1380 = vmatpush3.bf16.msra.mxu1 %v1496_v31  ;;  %1359 = vmatprep.subr.bf16.mxu0 %v1497_v32 }
  0x75   :  { %1381 = vmatprep.subr.bf16.mxu1 %v1498_v33 }
  0x77   :  { %1360 = vmatpush3.bf16.msra.mxu0 %v1499_v34 }
  0x78   :  { %1382 = vmatpush3.bf16.msra.mxu1 %v1500_v35  ;;  %1361 = vmatprep.subr.bf16.mxu0 %v1501_v36 }
  0x79   :  { %1383 = vmatprep.subr.bf16.mxu1 %v1502_v37 }
  0x7b   :  { %1362 = vmatpush3.bf16.msra.mxu0 %v1503_v38 }
  0x7c   :  { %1384 = vmatpush3.bf16.msra.mxu1 %v1504_v39 }
  0x7e   :  { %1077 = vmatmul.mubr.bf16.vlgmr.msra.gmra.mxu0 %v1505_v40 }
  0x7f   :  { %1118 = vmatmul.mubr.bf16.vlgmr.msra.gmra.mxu1 %v1508_v42 }
  0xfe   :  { %v1275_v44 = vpop.f32.mrf.mxu0 }
  0xff   :  { %v1297_v45 = vpop.f32.mrf.mxu1 }
 0x100   :  { %v1276_v46 = vpop.f32.mrf.mxu0 }
 0x101   :  { %v1298_v47 = vpop.f32.mrf.mxu1  ;;  %v1277_v57 = vadd.f32 %v1276_v46, %v1275_v44 }
 0x102   :  { %v1278_v48 = vpop.f32.mrf.mxu0  ;;  %v1299_v58 = vadd.f32 %v1298_v47, %v1297_v45 }
 0x103   :  { %v1300_v49 = vpop.f32.mrf.mxu1 }
 0x104   :  { %v1279_v50 = vpop.f32.mrf.mxu0  ;;  %v956_v0 = vadd.f32 %v1299_v58, %v1277_v57 }
 0x105   :  { %v1301_v52 = vpop.f32.mrf.mxu1  ;;  %v1280_v61 = vadd.f32 %v1279_v50, %v1278_v48 }
 0x106   :  { %v1302_v62 = vadd.f32 %v1301_v52, %v1300_v49 }
 0x108   :  { %v959_v4 = vadd.f32 %v1302_v62, %v1280_v61 }
 0x11e   :  { %v1319_v51 = vpop.f32.mrf.mxu0 }
 0x11f   :  { %v1341_v53 = vpop.f32.mrf.mxu1 }
 0x120   :  { %v1320_v54 = vpop.f32.mrf.mxu0 }
 0x121   :  { %v1342_v55 = vpop.f32.mrf.mxu1  ;;  %v1321_v63 = vadd.f32 %v1320_v54, %v1319_v51 }
 0x122   :  { %v1322_v56 = vpop.f32.mrf.mxu0  ;;  %v1343_v6 = vadd.f32 %v1342_v55, %v1341_v53 }
 0x123   :  { %v1344_v59 = vpop.f32.mrf.mxu1  ;;  %v997_v5 = vadd.f32 %v1321_v63, %v956_v0 }
 0x124   :  { %v1323_v60 = vpop.f32.mrf.mxu0 }
 0x125   :  { %v1324_v1 = vadd.f32 %v1323_v60, %v1322_v56  ;;  %v1345_v2 = vpop.f32.mrf.mxu1  ;;  %v1038_v13 = vadd.f32 %v1343_v6, %v997_v5 }
 0x126   :  { %v1346_v14 = vadd.f32 %v1345_v2, %v1344_v59 }
 0x127   :  { %v1000_v9 = vadd.f32 %v1324_v1, %v959_v4 }
 0x129   :  { %v1041_v17 = vadd.f32 %v1346_v14, %v1000_v9 }
 0x13e   :  { %v1363_v3 = vpop.f32.mrf.mxu0 }
 0x13f   :  { %v1385_v7 = vpop.f32.mrf.mxu1 }
 0x140   :  { %v1364_v8 = vpop.f32.mrf.mxu0 }
 0x141   :  { %v1365_v10 = vadd.f32 %v1364_v8, %v1363_v3  ;;  %v1386_v11 = vpop.f32.mrf.mxu1 }
 0x142   :  { %v1366_v12 = vpop.f32.mrf.mxu0  ;;  %v1387_v21 = vadd.f32 %v1386_v11, %v1385_v7 }
 0x143   :  { %v1388_v15 = vpop.f32.mrf.mxu1  ;;  %v1079_v18 = vadd.f32 %v1365_v10, %v1038_v13 }
 0x144   :  { %v1367_v16 = vpop.f32.mrf.mxu0 }
 0x145   :  { %v1368_v19 = vadd.f32 %v1367_v16, %v1366_v12  ;;  %v1389_v20 = vpop.f32.mrf.mxu1  ;;  %v1120_v24 = vadd.f32 %v1387_v21, %v1079_v18 }
 0x146   :  { %v1390_v23 = vadd.f32 %v1389_v20, %v1388_v15 }
 0x147   :  { %v1082_v22 = vadd.f32 %v1368_v19, %v1041_v17 }
 0x149   :  { %v1123_v25 = vadd.f32 %v1390_v23, %v1082_v22 }
 0x14b   :  { %v1257_v26 = vpack.c.bf16 %v1123_v25, %v1120_v24 }
 0x14d   :  { %1258 = vst [vmem:[%s1587_s2] sm:$0xff] %v1257_v26  }
 0x14e   :  { %1140 = vsyncpa [#allocation3], 1 }
 0x14f   :  { %1141 = vsyncpa [#allocation5], 1 }

</bundles_post_ra>
